<compile_context>
chip_gen: v7x
topology: tpu7x:2x2x1
jax: 0.10.0
libtpu: 0.0.40
codegen_flags: <defaults>
</compile_context>

<pallas_src>
import jax
import jax.numpy as jnp
import numpy as np
from jax import lax
from jax.experimental import pallas as pl
from jax.experimental.pallas import tpu as pltpu

THRESHOLD = 1.0  # snntorch Leaky default
# beta = 1.0 (clamped to [0,1] by snntorch), so the membrane decay is identity.


def _spiking_kernel(x_ref, wcat_ref, bcat_ref, w2_ref, b2_ref, out_ref):
    num_steps, B, N = out_ref.shape
    H = wcat_ref.shape[1]

    # Hoist weight/bias loads out of the recurrent loop.
    w_cat = wcat_ref[...]          # (N+H, H)  = [W1; W_rec]
    b_cat = bcat_ref[...]          # (1, H)    = b1 + b_rec
    w2 = w2_ref[...]               # (H, N)
    b2 = b2_ref[...]               # (1, N)

    # Fused fc1 input state: [:, :N] = feedback current (x at t=0, spk2 later),
    #                        [:, N:] = previous-step spk1.
    state0 = jnp.concatenate(
        [x_ref[...], jnp.zeros((B, H), jnp.float32)], axis=1)   # (B, N+H)
    mem1_0 = jnp.zeros((B, H), jnp.float32)
    mem2_0 = jnp.zeros((B, N), jnp.float32)

    def step(t, carry):
        state, mem1, mem2 = carry

        # cur1 = fc1(feed) + fc_recurrent(spk1_last), fused into one MXU pass.
        cur1 = jnp.dot(state, w_cat, preferred_element_type=jnp.float32) + b_cat

        # LIF1: subtract-reset uses the *previous* membrane; spk = mem > thr.
        reset1 = (mem1 > THRESHOLD).astype(jnp.float32)
        mem1 = mem1 + cur1 - reset1 * THRESHOLD
        spk1 = (mem1 > THRESHOLD).astype(jnp.float32)

        # cur2 = fc2(spk1)
        cur2 = jnp.dot(spk1, w2, preferred_element_type=jnp.float32) + b2

        # LIF2
        reset2 = (mem2 > THRESHOLD).astype(jnp.float32)
        mem2 = mem2 + cur2 - reset2 * THRESHOLD
        spk2 = (mem2 > THRESHOLD).astype(jnp.float32)

        # Full (B, N) tile store into the VMEM-resident output; the single
        # HBM writeback of the whole (num_steps, B, N) block happens after
        # the kernel finishes.
        out_ref[t] = spk2

        # New fused state: feedback input = spk2, previous spk1 = spk1.
        return (jnp.concatenate([spk2, spk1], axis=1), mem1, mem2)

    unroll = num_steps if num_steps <= 32 else 8
    lax.fori_loop(0, num_steps, step, (state0, mem1_0, mem2_0), unroll=unroll)


def spiking_generator(x, params, num_steps):
    """x: (B, num_neurons) f32. Returns (B, num_steps, num_neurons) f32 spikes."""
    w1, b1, wr, br, w2, b2 = params
    B, N = x.shape
    H = w1.shape[1]

    # Fuse fc1 + fc_recurrent: one (N+H, H) weight, one bias (algebraically
    # identical to fc1(inp) + fc_recurrent(spk1_last)).
    w_cat = jnp.concatenate([w1, wr], axis=0)   # (N+H, H)
    b_cat = b1 + br                             # (1, H)

    # Single grid point: the whole time loop is internal to the kernel, so
    # there is no per-step pipeline overhead and weights are resident once.
    # TODO(synk): for large B on v7x, add a leading "parallel" batch grid axis
    # so each TensorCore handles an independent batch shard.
    grid_spec = pltpu.PrefetchScalarGridSpec(
        num_scalar_prefetch=0,
        grid=(1,),
        in_specs=[
            pl.BlockSpec((B, N), lambda i: (0, 0)),        # x
            pl.BlockSpec((N + H, H), lambda i: (0, 0)),    # W_cat
            pl.BlockSpec((1, H), lambda i: (0, 0)),        # b_cat
            pl.BlockSpec((H, N), lambda i: (0, 0)),        # W2
            pl.BlockSpec((1, N), lambda i: (0, 0)),        # b2
        ],
        # (num_steps, B, N): each step writes a full (B, N) slab; transpose
        # to (B, num_steps, N) in the wrapper (layout plumbing only).
        out_specs=pl.BlockSpec((num_steps, B, N), lambda i: (0, 0, 0)),
    )

    out = pl.pallas_call(
        _spiking_kernel,
        out_shape=jax.ShapeDtypeStruct((num_steps, B, N), jnp.float32),
        grid_spec=grid_spec,
        compiler_params=pltpu.CompilerParams(
            dimension_semantics=("arbitrary",)),
    )(x, w_cat, b_cat, w2, b2)

    return jnp.transpose(out, (1, 0, 2))   # (B, num_steps, N)


def init_params(key, num_neurons, num_hidden):
    """Deterministic PyTorch-Linear-style init: U(-1/sqrt(fan_in), 1/sqrt(fan_in))."""
    ks = jax.random.split(key, 6)

    def lin(kw, kb, fan_in, fan_out):
        bound = 1.0 / np.sqrt(fan_in)
        w = jax.random.uniform(kw, (fan_in, fan_out), jnp.float32, -bound, bound)
        b = jax.random.uniform(kb, (1, fan_out), jnp.float32, -bound, bound)
        return w, b

    w1, b1 = lin(ks[0], ks[1], num_neurons, num_hidden)   # fc1
    wr, br = lin(ks[2], ks[3], num_hidden, num_hidden)    # fc_recurrent
    w2, b2 = lin(ks[4], ks[5], num_hidden, num_neurons)   # fc2
    return (w1, b1, wr, br, w2, b2)


def reference(x, params, num_steps):
    """Pure-JAX reference mirroring the PyTorch/snntorch forward.

    fc1(inp) + fc_recurrent(spk1_last) is evaluated with the same concatenated
    weight/bias used by the kernel; this is algebraically identical to the two
    separate nn.Linear calls in the PyTorch module.
    """
    w1, b1, wr, br, w2, b2 = params
    B = x.shape[0]
    H = w1.shape[1]
    N = w2.shape[1]
    w_cat = jnp.concatenate([w1, wr], axis=0)
    b_cat = b1 + br

    mem1 = jnp.zeros((B, H), jnp.float32)
    mem2 = jnp.zeros((B, N), jnp.float32)
    spk1_last = jnp.zeros((B, H), jnp.float32)
    cur_in = x
    outs = []
    for _ in range(num_steps):
        cur1 = jnp.concatenate([cur_in, spk1_last], axis=1) @ w_cat + b_cat
        reset1 = (mem1 > THRESHOLD).astype(jnp.float32)
        mem1 = mem1 + cur1 - reset1 * THRESHOLD
        spk1 = (mem1 > THRESHOLD).astype(jnp.float32)
        spk1_last = spk1
        cur2 = spk1 @ w2 + b2
        reset2 = (mem2 > THRESHOLD).astype(jnp.float32)
        mem2 = mem2 + cur2 - reset2 * THRESHOLD
        spk2 = (mem2 > THRESHOLD).astype(jnp.float32)
        cur_in = spk2
        outs.append(spk2)
    return jnp.stack(outs, axis=1)


if __name__ == "__main__":
    num_neurons = 16
    num_hidden = 32
    batch = 2
    num_steps = 8

    key = jax.random.PRNGKey(0)
    k_x, k_p = jax.random.split(key)
    x = jax.random.uniform(k_x, (batch, num_neurons), jnp.float32)
    params = init_params(k_p, num_neurons, num_hidden)

    out = jax.block_until_ready(spiking_generator(x, params, num_steps))
    ref = jax.block_until_ready(reference(x, params, num_steps))

    assert out.shape == (batch, num_steps, num_neurons), out.shape
    assert np.allclose(np.asarray(out), np.asarray(ref), atol=1e-5), "mismatch vs reference"
    print("KERNEL_OK")
</pallas_src>

<mosaic_0001>
module attributes {stable_mosaic.version = 11 : i64} {
  func.func @_spiking_kernel(%arg0: i32, %arg1: memref<2x16xf32, #tpu.memory_space<vmem>>, %arg2: memref<48x32xf32, #tpu.memory_space<vmem>>, %arg3: memref<1x32xf32, #tpu.memory_space<vmem>>, %arg4: memref<32x16xf32, #tpu.memory_space<vmem>>, %arg5: memref<1x16xf32, #tpu.memory_space<vmem>>, %arg6: memref<8x2x16xf32, #tpu.memory_space<vmem>>) attributes {dimension_semantics = [#tpu.dimension_semantics<arbitrary>], iteration_bounds = array<i64: 1>, scalar_prefetch = 0 : i64, scratch_operands = 0 : i64, tpu.core_type = #tpu.core_type<tc>, window_params = [{pipeline_mode = #tpu.pipeline_mode<synchronous>, transform_indices = @transform_0, window_bounds = array<i64: 2, 16>}, {pipeline_mode = #tpu.pipeline_mode<synchronous>, transform_indices = @transform_1, window_bounds = array<i64: 48, 32>}, {pipeline_mode = #tpu.pipeline_mode<synchronous>, transform_indices = @transform_2, window_bounds = array<i64: 1, 32>}, {pipeline_mode = #tpu.pipeline_mode<synchronous>, transform_indices = @transform_3, window_bounds = array<i64: 32, 16>}, {pipeline_mode = #tpu.pipeline_mode<synchronous>, transform_indices = @transform_4, window_bounds = array<i64: 1, 16>}, {pipeline_mode = #tpu.pipeline_mode<synchronous>, transform_indices = @transform_5, window_bounds = array<i64: 8, 2, 16>}]} {
    %c0 = arith.constant 0 : index
    %c0_0 = arith.constant 0 : index
    %0 = vector.load %arg2[%c0, %c0_0] : memref<48x32xf32, #tpu.memory_space<vmem>>, vector<48x32xf32>
    %c0_1 = arith.constant 0 : index
    %c0_2 = arith.constant 0 : index
    %1 = vector.load %arg3[%c0_1, %c0_2] : memref<1x32xf32, #tpu.memory_space<vmem>>, vector<1x32xf32>
    %c0_3 = arith.constant 0 : index
    %c0_4 = arith.constant 0 : index
    %2 = vector.load %arg4[%c0_3, %c0_4] : memref<32x16xf32, #tpu.memory_space<vmem>>, vector<32x16xf32>
    %c0_5 = arith.constant 0 : index
    %c0_6 = arith.constant 0 : index
    %3 = vector.load %arg5[%c0_5, %c0_6] : memref<1x16xf32, #tpu.memory_space<vmem>>, vector<1x16xf32>
    %c0_7 = arith.constant 0 : index
    %c0_8 = arith.constant 0 : index
    %4 = vector.load %arg1[%c0_7, %c0_8] : memref<2x16xf32, #tpu.memory_space<vmem>>, vector<2x16xf32>
    %cst = arith.constant 0.000000e+00 : f32
    %5 = vector.broadcast %cst : f32 to vector<2x32xf32>
    %6 = tpu.concatenate %4, %5 in 1 : vector<2x16xf32>, vector<2x32xf32> -> vector<2x48xf32>
    %cst_9 = arith.constant 0.000000e+00 : f32
    %7 = vector.broadcast %cst_9 : f32 to vector<2x32xf32>
    %cst_10 = arith.constant 0.000000e+00 : f32
    %8 = vector.broadcast %cst_10 : f32 to vector<2x16xf32>
    %c0_i32 = arith.constant 0 : i32
    %cst_11 = arith.constant dense<0.000000e+00> : vector<2x32xf32>
    %9 = tpu.matmul %6, %0, %cst_11 {dimension_numbers = #tpu.dot_dimension_numbers<[1], [0], [0], [1], [0, 0, 1, 1], [], []>} : vector<2x48xf32>, vector<48x32xf32>, vector<2x32xf32> -> vector<2x32xf32>
    %10 = vector.broadcast %1 : vector<1x32xf32> to vector<2x32xf32>
    %11 = arith.addf %9, %10 : vector<2x32xf32>
    %cst_12 = arith.constant 1.000000e+00 : f32
    %12 = vector.broadcast %cst_12 : f32 to vector<2x32xf32>
    %13 = arith.cmpf ogt, %7, %12 : vector<2x32xf32>
    %14 = arith.extui %13 : vector<2x32xi1> to vector<2x32xi32>
    %15 = arith.sitofp %14 : vector<2x32xi32> to vector<2x32xf32>
    %16 = arith.addf %7, %11 : vector<2x32xf32>
    %cst_13 = arith.constant 1.000000e+00 : f32
    %17 = vector.broadcast %cst_13 : f32 to vector<2x32xf32>
    %18 = arith.mulf %15, %17 : vector<2x32xf32>
    %19 = arith.subf %16, %18 : vector<2x32xf32>
    %cst_14 = arith.constant 1.000000e+00 : f32
    %20 = vector.broadcast %cst_14 : f32 to vector<2x32xf32>
    %21 = arith.cmpf ogt, %19, %20 : vector<2x32xf32>
    %22 = arith.extui %21 : vector<2x32xi1> to vector<2x32xi32>
    %23 = arith.sitofp %22 : vector<2x32xi32> to vector<2x32xf32>
    %cst_15 = arith.constant dense<0.000000e+00> : vector<2x16xf32>
    %24 = tpu.matmul %23, %2, %cst_15 {dimension_numbers = #tpu.dot_dimension_numbers<[1], [0], [0], [1], [0, 0, 1, 1], [], []>} : vector<2x32xf32>, vector<32x16xf32>, vector<2x16xf32> -> vector<2x16xf32>
    %25 = vector.broadcast %3 : vector<1x16xf32> to vector<2x16xf32>
    %26 = arith.addf %24, %25 : vector<2x16xf32>
    %cst_16 = arith.constant 1.000000e+00 : f32
    %27 = vector.broadcast %cst_16 : f32 to vector<2x16xf32>
    %28 = arith.cmpf ogt, %8, %27 : vector<2x16xf32>
    %29 = arith.extui %28 : vector<2x16xi1> to vector<2x16xi32>
    %30 = arith.sitofp %29 : vector<2x16xi32> to vector<2x16xf32>
    %31 = arith.addf %8, %26 : vector<2x16xf32>
    %cst_17 = arith.constant 1.000000e+00 : f32
    %32 = vector.broadcast %cst_17 : f32 to vector<2x16xf32>
    %33 = arith.mulf %30, %32 : vector<2x16xf32>
    %34 = arith.subf %31, %33 : vector<2x16xf32>
    %cst_18 = arith.constant 1.000000e+00 : f32
    %35 = vector.broadcast %cst_18 : f32 to vector<2x16xf32>
    %36 = arith.cmpf ogt, %34, %35 : vector<2x16xf32>
    %37 = arith.extui %36 : vector<2x16xi1> to vector<2x16xi32>
    %38 = arith.sitofp %37 : vector<2x16xi32> to vector<2x16xf32>
    %39 = arith.index_cast %c0_i32 : i32 to index
    %c0_19 = arith.constant 0 : index
    %c0_20 = arith.constant 0 : index
    %40 = vector.load %arg6[%39, %c0_19, %c0_20] : memref<8x2x16xf32, #tpu.memory_space<vmem>>, vector<1x2x16xf32>
    %41 = vector.shape_cast %40 : vector<1x2x16xf32> to vector<2x16xf32>
    %42 = vector.shape_cast %38 : vector<2x16xf32> to vector<1x2x16xf32>
    tpu.vector_store %arg6[%39, %c0_19, %c0_20], %42 {strides = array<i32>} : memref<8x2x16xf32, #tpu.memory_space<vmem>>, vector<1x2x16xf32>,
    %43 = tpu.concatenate %38, %23 in 1 : vector<2x16xf32>, vector<2x32xf32> -> vector<2x48xf32>
    %c1_i32 = arith.constant 1 : i32
    %cst_21 = arith.constant dense<0.000000e+00> : vector<2x32xf32>
    %44 = tpu.matmul %43, %0, %cst_21 {dimension_numbers = #tpu.dot_dimension_numbers<[1], [0], [0], [1], [0, 0, 1, 1], [], []>} : vector<2x48xf32>, vector<48x32xf32>, vector<2x32xf32> -> vector<2x32xf32>
    %45 = vector.broadcast %1 : vector<1x32xf32> to vector<2x32xf32>
    %46 = arith.addf %44, %45 : vector<2x32xf32>
    %cst_22 = arith.constant 1.000000e+00 : f32
    %47 = vector.broadcast %cst_22 : f32 to vector<2x32xf32>
    %48 = arith.cmpf ogt, %19, %47 : vector<2x32xf32>
    %49 = arith.extui %48 : vector<2x32xi1> to vector<2x32xi32>
    %50 = arith.sitofp %49 : vector<2x32xi32> to vector<2x32xf32>
    %51 = arith.addf %19, %46 : vector<2x32xf32>
    %cst_23 = arith.constant 1.000000e+00 : f32
    %52 = vector.broadcast %cst_23 : f32 to vector<2x32xf32>
    %53 = arith.mulf %50, %52 : vector<2x32xf32>
    %54 = arith.subf %51, %53 : vector<2x32xf32>
    %cst_24 = arith.constant 1.000000e+00 : f32
    %55 = vector.broadcast %cst_24 : f32 to vector<2x32xf32>
    %56 = arith.cmpf ogt, %54, %55 : vector<2x32xf32>
    %57 = arith.extui %56 : vector<2x32xi1> to vector<2x32xi32>
    %58 = arith.sitofp %57 : vector<2x32xi32> to vector<2x32xf32>
    %cst_25 = arith.constant dense<0.000000e+00> : vector<2x16xf32>
    %59 = tpu.matmul %58, %2, %cst_25 {dimension_numbers = #tpu.dot_dimension_numbers<[1], [0], [0], [1], [0, 0, 1, 1], [], []>} : vector<2x32xf32>, vector<32x16xf32>, vector<2x16xf32> -> vector<2x16xf32>
    %60 = vector.broadcast %3 : vector<1x16xf32> to vector<2x16xf32>
    %61 = arith.addf %59, %60 : vector<2x16xf32>
    %cst_26 = arith.constant 1.000000e+00 : f32
    %62 = vector.broadcast %cst_26 : f32 to vector<2x16xf32>
    %63 = arith.cmpf ogt, %34, %62 : vector<2x16xf32>
    %64 = arith.extui %63 : vector<2x16xi1> to vector<2x16xi32>
    %65 = arith.sitofp %64 : vector<2x16xi32> to vector<2x16xf32>
    %66 = arith.addf %34, %61 : vector<2x16xf32>
    %cst_27 = arith.constant 1.000000e+00 : f32
    %67 = vector.broadcast %cst_27 : f32 to vector<2x16xf32>
    %68 = arith.mulf %65, %67 : vector<2x16xf32>
    %69 = arith.subf %66, %68 : vector<2x16xf32>
    %cst_28 = arith.constant 1.000000e+00 : f32
    %70 = vector.broadcast %cst_28 : f32 to vector<2x16xf32>
    %71 = arith.cmpf ogt, %69, %70 : vector<2x16xf32>
    %72 = arith.extui %71 : vector<2x16xi1> to vector<2x16xi32>
    %73 = arith.sitofp %72 : vector<2x16xi32> to vector<2x16xf32>
    %74 = arith.index_cast %c1_i32 : i32 to index
    %c0_29 = arith.constant 0 : index
    %c0_30 = arith.constant 0 : index
    %75 = vector.load %arg6[%74, %c0_29, %c0_30] : memref<8x2x16xf32, #tpu.memory_space<vmem>>, vector<1x2x16xf32>
    %76 = vector.shape_cast %75 : vector<1x2x16xf32> to vector<2x16xf32>
    %77 = vector.shape_cast %73 : vector<2x16xf32> to vector<1x2x16xf32>
    tpu.vector_store %arg6[%74, %c0_29, %c0_30], %77 {strides = array<i32>} : memref<8x2x16xf32, #tpu.memory_space<vmem>>, vector<1x2x16xf32>,
    %78 = tpu.concatenate %73, %58 in 1 : vector<2x16xf32>, vector<2x32xf32> -> vector<2x48xf32>
    %c2_i32 = arith.constant 2 : i32
    %cst_31 = arith.constant dense<0.000000e+00> : vector<2x32xf32>
    %79 = tpu.matmul %78, %0, %cst_31 {dimension_numbers = #tpu.dot_dimension_numbers<[1], [0], [0], [1], [0, 0, 1, 1], [], []>} : vector<2x48xf32>, vector<48x32xf32>, vector<2x32xf32> -> vector<2x32xf32>
    %80 = vector.broadcast %1 : vector<1x32xf32> to vector<2x32xf32>
    %81 = arith.addf %79, %80 : vector<2x32xf32>
    %cst_32 = arith.constant 1.000000e+00 : f32
    %82 = vector.broadcast %cst_32 : f32 to vector<2x32xf32>
    %83 = arith.cmpf ogt, %54, %82 : vector<2x32xf32>
    %84 = arith.extui %83 : vector<2x32xi1> to vector<2x32xi32>
    %85 = arith.sitofp %84 : vector<2x32xi32> to vector<2x32xf32>
    %86 = arith.addf %54, %81 : vector<2x32xf32>
    %cst_33 = arith.constant 1.000000e+00 : f32
    %87 = vector.broadcast %cst_33 : f32 to vector<2x32xf32>
    %88 = arith.mulf %85, %87 : vector<2x32xf32>
    %89 = arith.subf %86, %88 : vector<2x32xf32>
    %cst_34 = arith.constant 1.000000e+00 : f32
    %90 = vector.broadcast %cst_34 : f32 to vector<2x32xf32>
    %91 = arith.cmpf ogt, %89, %90 : vector<2x32xf32>
    %92 = arith.extui %91 : vector<2x32xi1> to vector<2x32xi32>
    %93 = arith.sitofp %92 : vector<2x32xi32> to vector<2x32xf32>
    %cst_35 = arith.constant dense<0.000000e+00> : vector<2x16xf32>
    %94 = tpu.matmul %93, %2, %cst_35 {dimension_numbers = #tpu.dot_dimension_numbers<[1], [0], [0], [1], [0, 0, 1, 1], [], []>} : vector<2x32xf32>, vector<32x16xf32>, vector<2x16xf32> -> vector<2x16xf32>
    %95 = vector.broadcast %3 : vector<1x16xf32> to vector<2x16xf32>
    %96 = arith.addf %94, %95 : vector<2x16xf32>
    %cst_36 = arith.constant 1.000000e+00 : f32
    %97 = vector.broadcast %cst_36 : f32 to vector<2x16xf32>
    %98 = arith.cmpf ogt, %69, %97 : vector<2x16xf32>
    %99 = arith.extui %98 : vector<2x16xi1> to vector<2x16xi32>
    %100 = arith.sitofp %99 : vector<2x16xi32> to vector<2x16xf32>
    %101 = arith.addf %69, %96 : vector<2x16xf32>
    %cst_37 = arith.constant 1.000000e+00 : f32
    %102 = vector.broadcast %cst_37 : f32 to vector<2x16xf32>
    %103 = arith.mulf %100, %102 : vector<2x16xf32>
    %104 = arith.subf %101, %103 : vector<2x16xf32>
    %cst_38 = arith.constant 1.000000e+00 : f32
    %105 = vector.broadcast %cst_38 : f32 to vector<2x16xf32>
    %106 = arith.cmpf ogt, %104, %105 : vector<2x16xf32>
    %107 = arith.extui %106 : vector<2x16xi1> to vector<2x16xi32>
    %108 = arith.sitofp %107 : vector<2x16xi32> to vector<2x16xf32>
    %109 = arith.index_cast %c2_i32 : i32 to index
    %c0_39 = arith.constant 0 : index
    %c0_40 = arith.constant 0 : index
    %110 = vector.load %arg6[%109, %c0_39, %c0_40] : memref<8x2x16xf32, #tpu.memory_space<vmem>>, vector<1x2x16xf32>
    %111 = vector.shape_cast %110 : vector<1x2x16xf32> to vector<2x16xf32>
    %112 = vector.shape_cast %108 : vector<2x16xf32> to vector<1x2x16xf32>
    tpu.vector_store %arg6[%109, %c0_39, %c0_40], %112 {strides = array<i32>} : memref<8x2x16xf32, #tpu.memory_space<vmem>>, vector<1x2x16xf32>,
    %113 = tpu.concatenate %108, %93 in 1 : vector<2x16xf32>, vector<2x32xf32> -> vector<2x48xf32>
    %c3_i32 = arith.constant 3 : i32
    %cst_41 = arith.constant dense<0.000000e+00> : vector<2x32xf32>
    %114 = tpu.matmul %113, %0, %cst_41 {dimension_numbers = #tpu.dot_dimension_numbers<[1], [0], [0], [1], [0, 0, 1, 1], [], []>} : vector<2x48xf32>, vector<48x32xf32>, vector<2x32xf32> -> vector<2x32xf32>
    %115 = vector.broadcast %1 : vector<1x32xf32> to vector<2x32xf32>
    %116 = arith.addf %114, %115 : vector<2x32xf32>
    %cst_42 = arith.constant 1.000000e+00 : f32
    %117 = vector.broadcast %cst_42 : f32 to vector<2x32xf32>
    %118 = arith.cmpf ogt, %89, %117 : vector<2x32xf32>
    %119 = arith.extui %118 : vector<2x32xi1> to vector<2x32xi32>
    %120 = arith.sitofp %119 : vector<2x32xi32> to vector<2x32xf32>
    %121 = arith.addf %89, %116 : vector<2x32xf32>
    %cst_43 = arith.constant 1.000000e+00 : f32
    %122 = vector.broadcast %cst_43 : f32 to vector<2x32xf32>
    %123 = arith.mulf %120, %122 : vector<2x32xf32>
    %124 = arith.subf %121, %123 : vector<2x32xf32>
    %cst_44 = arith.constant 1.000000e+00 : f32
    %125 = vector.broadcast %cst_44 : f32 to vector<2x32xf32>
    %126 = arith.cmpf ogt, %124, %125 : vector<2x32xf32>
    %127 = arith.extui %126 : vector<2x32xi1> to vector<2x32xi32>
    %128 = arith.sitofp %127 : vector<2x32xi32> to vector<2x32xf32>
    %cst_45 = arith.constant dense<0.000000e+00> : vector<2x16xf32>
    %129 = tpu.matmul %128, %2, %cst_45 {dimension_numbers = #tpu.dot_dimension_numbers<[1], [0], [0], [1], [0, 0, 1, 1], [], []>} : vector<2x32xf32>, vector<32x16xf32>, vector<2x16xf32> -> vector<2x16xf32>
    %130 = vector.broadcast %3 : vector<1x16xf32> to vector<2x16xf32>
    %131 = arith.addf %129, %130 : vector<2x16xf32>
    %cst_46 = arith.constant 1.000000e+00 : f32
    %132 = vector.broadcast %cst_46 : f32 to vector<2x16xf32>
    %133 = arith.cmpf ogt, %104, %132 : vector<2x16xf32>
    %134 = arith.extui %133 : vector<2x16xi1> to vector<2x16xi32>
    %135 = arith.sitofp %134 : vector<2x16xi32> to vector<2x16xf32>
    %136 = arith.addf %104, %131 : vector<2x16xf32>
    %cst_47 = arith.constant 1.000000e+00 : f32
    %137 = vector.broadcast %cst_47 : f32 to vector<2x16xf32>
    %138 = arith.mulf %135, %137 : vector<2x16xf32>
    %139 = arith.subf %136, %138 : vector<2x16xf32>
    %cst_48 = arith.constant 1.000000e+00 : f32
    %140 = vector.broadcast %cst_48 : f32 to vector<2x16xf32>
    %141 = arith.cmpf ogt, %139, %140 : vector<2x16xf32>
    %142 = arith.extui %141 : vector<2x16xi1> to vector<2x16xi32>
    %143 = arith.sitofp %142 : vector<2x16xi32> to vector<2x16xf32>
    %144 = arith.index_cast %c3_i32 : i32 to index
    %c0_49 = arith.constant 0 : index
    %c0_50 = arith.constant 0 : index
    %145 = vector.load %arg6[%144, %c0_49, %c0_50] : memref<8x2x16xf32, #tpu.memory_space<vmem>>, vector<1x2x16xf32>
    %146 = vector.shape_cast %145 : vector<1x2x16xf32> to vector<2x16xf32>
    %147 = vector.shape_cast %143 : vector<2x16xf32> to vector<1x2x16xf32>
    tpu.vector_store %arg6[%144, %c0_49, %c0_50], %147 {strides = array<i32>} : memref<8x2x16xf32, #tpu.memory_space<vmem>>, vector<1x2x16xf32>,
    %148 = tpu.concatenate %143, %128 in 1 : vector<2x16xf32>, vector<2x32xf32> -> vector<2x48xf32>
    %c4_i32 = arith.constant 4 : i32
    %cst_51 = arith.constant dense<0.000000e+00> : vector<2x32xf32>
    %149 = tpu.matmul %148, %0, %cst_51 {dimension_numbers = #tpu.dot_dimension_numbers<[1], [0], [0], [1], [0, 0, 1, 1], [], []>} : vector<2x48xf32>, vector<48x32xf32>, vector<2x32xf32> -> vector<2x32xf32>
    %150 = vector.broadcast %1 : vector<1x32xf32> to vector<2x32xf32>
    %151 = arith.addf %149, %150 : vector<2x32xf32>
    %cst_52 = arith.constant 1.000000e+00 : f32
    %152 = vector.broadcast %cst_52 : f32 to vector<2x32xf32>
    %153 = arith.cmpf ogt, %124, %152 : vector<2x32xf32>
    %154 = arith.extui %153 : vector<2x32xi1> to vector<2x32xi32>
    %155 = arith.sitofp %154 : vector<2x32xi32> to vector<2x32xf32>
    %156 = arith.addf %124, %151 : vector<2x32xf32>
    %cst_53 = arith.constant 1.000000e+00 : f32
    %157 = vector.broadcast %cst_53 : f32 to vector<2x32xf32>
    %158 = arith.mulf %155, %157 : vector<2x32xf32>
    %159 = arith.subf %156, %158 : vector<2x32xf32>
    %cst_54 = arith.constant 1.000000e+00 : f32
    %160 = vector.broadcast %cst_54 : f32 to vector<2x32xf32>
    %161 = arith.cmpf ogt, %159, %160 : vector<2x32xf32>
    %162 = arith.extui %161 : vector<2x32xi1> to vector<2x32xi32>
    %163 = arith.sitofp %162 : vector<2x32xi32> to vector<2x32xf32>
    %cst_55 = arith.constant dense<0.000000e+00> : vector<2x16xf32>
    %164 = tpu.matmul %163, %2, %cst_55 {dimension_numbers = #tpu.dot_dimension_numbers<[1], [0], [0], [1], [0, 0, 1, 1], [], []>} : vector<2x32xf32>, vector<32x16xf32>, vector<2x16xf32> -> vector<2x16xf32>
    %165 = vector.broadcast %3 : vector<1x16xf32> to vector<2x16xf32>
    %166 = arith.addf %164, %165 : vector<2x16xf32>
    %cst_56 = arith.constant 1.000000e+00 : f32
    %167 = vector.broadcast %cst_56 : f32 to vector<2x16xf32>
    %168 = arith.cmpf ogt, %139, %167 : vector<2x16xf32>
    %169 = arith.extui %168 : vector<2x16xi1> to vector<2x16xi32>
    %170 = arith.sitofp %169 : vector<2x16xi32> to vector<2x16xf32>
    %171 = arith.addf %139, %166 : vector<2x16xf32>
    %cst_57 = arith.constant 1.000000e+00 : f32
    %172 = vector.broadcast %cst_57 : f32 to vector<2x16xf32>
    %173 = arith.mulf %170, %172 : vector<2x16xf32>
    %174 = arith.subf %171, %173 : vector<2x16xf32>
    %cst_58 = arith.constant 1.000000e+00 : f32
    %175 = vector.broadcast %cst_58 : f32 to vector<2x16xf32>
    %176 = arith.cmpf ogt, %174, %175 : vector<2x16xf32>
    %177 = arith.extui %176 : vector<2x16xi1> to vector<2x16xi32>
    %178 = arith.sitofp %177 : vector<2x16xi32> to vector<2x16xf32>
    %179 = arith.index_cast %c4_i32 : i32 to index
    %c0_59 = arith.constant 0 : index
    %c0_60 = arith.constant 0 : index
    %180 = vector.load %arg6[%179, %c0_59, %c0_60] : memref<8x2x16xf32, #tpu.memory_space<vmem>>, vector<1x2x16xf32>
    %181 = vector.shape_cast %180 : vector<1x2x16xf32> to vector<2x16xf32>
    %182 = vector.shape_cast %178 : vector<2x16xf32> to vector<1x2x16xf32>
    tpu.vector_store %arg6[%179, %c0_59, %c0_60], %182 {strides = array<i32>} : memref<8x2x16xf32, #tpu.memory_space<vmem>>, vector<1x2x16xf32>,
    %183 = tpu.concatenate %178, %163 in 1 : vector<2x16xf32>, vector<2x32xf32> -> vector<2x48xf32>
    %c5_i32 = arith.constant 5 : i32
    %cst_61 = arith.constant dense<0.000000e+00> : vector<2x32xf32>
    %184 = tpu.matmul %183, %0, %cst_61 {dimension_numbers = #tpu.dot_dimension_numbers<[1], [0], [0], [1], [0, 0, 1, 1], [], []>} : vector<2x48xf32>, vector<48x32xf32>, vector<2x32xf32> -> vector<2x32xf32>
    %185 = vector.broadcast %1 : vector<1x32xf32> to vector<2x32xf32>
    %186 = arith.addf %184, %185 : vector<2x32xf32>
    %cst_62 = arith.constant 1.000000e+00 : f32
    %187 = vector.broadcast %cst_62 : f32 to vector<2x32xf32>
    %188 = arith.cmpf ogt, %159, %187 : vector<2x32xf32>
    %189 = arith.extui %188 : vector<2x32xi1> to vector<2x32xi32>
    %190 = arith.sitofp %189 : vector<2x32xi32> to vector<2x32xf32>
    %191 = arith.addf %159, %186 : vector<2x32xf32>
    %cst_63 = arith.constant 1.000000e+00 : f32
    %192 = vector.broadcast %cst_63 : f32 to vector<2x32xf32>
    %193 = arith.mulf %190, %192 : vector<2x32xf32>
    %194 = arith.subf %191, %193 : vector<2x32xf32>
    %cst_64 = arith.constant 1.000000e+00 : f32
    %195 = vector.broadcast %cst_64 : f32 to vector<2x32xf32>
    %196 = arith.cmpf ogt, %194, %195 : vector<2x32xf32>
    %197 = arith.extui %196 : vector<2x32xi1> to vector<2x32xi32>
    %198 = arith.sitofp %197 : vector<2x32xi32> to vector<2x32xf32>
    %cst_65 = arith.constant dense<0.000000e+00> : vector<2x16xf32>
    %199 = tpu.matmul %198, %2, %cst_65 {dimension_numbers = #tpu.dot_dimension_numbers<[1], [0], [0], [1], [0, 0, 1, 1], [], []>} : vector<2x32xf32>, vector<32x16xf32>, vector<2x16xf32> -> vector<2x16xf32>
    %200 = vector.broadcast %3 : vector<1x16xf32> to vector<2x16xf32>
    %201 = arith.addf %199, %200 : vector<2x16xf32>
    %cst_66 = arith.constant 1.000000e+00 : f32
    %202 = vector.broadcast %cst_66 : f32 to vector<2x16xf32>
    %203 = arith.cmpf ogt, %174, %202 : vector<2x16xf32>
    %204 = arith.extui %203 : vector<2x16xi1> to vector<2x16xi32>
    %205 = arith.sitofp %204 : vector<2x16xi32> to vector<2x16xf32>
    %206 = arith.addf %174, %201 : vector<2x16xf32>
    %cst_67 = arith.constant 1.000000e+00 : f32
    %207 = vector.broadcast %cst_67 : f32 to vector<2x16xf32>
    %208 = arith.mulf %205, %207 : vector<2x16xf32>
    %209 = arith.subf %206, %208 : vector<2x16xf32>
    %cst_68 = arith.constant 1.000000e+00 : f32
    %210 = vector.broadcast %cst_68 : f32 to vector<2x16xf32>
    %211 = arith.cmpf ogt, %209, %210 : vector<2x16xf32>
    %212 = arith.extui %211 : vector<2x16xi1> to vector<2x16xi32>
    %213 = arith.sitofp %212 : vector<2x16xi32> to vector<2x16xf32>
    %214 = arith.index_cast %c5_i32 : i32 to index
    %c0_69 = arith.constant 0 : index
    %c0_70 = arith.constant 0 : index
    %215 = vector.load %arg6[%214, %c0_69, %c0_70] : memref<8x2x16xf32, #tpu.memory_space<vmem>>, vector<1x2x16xf32>
    %216 = vector.shape_cast %215 : vector<1x2x16xf32> to vector<2x16xf32>
    %217 = vector.shape_cast %213 : vector<2x16xf32> to vector<1x2x16xf32>
    tpu.vector_store %arg6[%214, %c0_69, %c0_70], %217 {strides = array<i32>} : memref<8x2x16xf32, #tpu.memory_space<vmem>>, vector<1x2x16xf32>,
    %218 = tpu.concatenate %213, %198 in 1 : vector<2x16xf32>, vector<2x32xf32> -> vector<2x48xf32>
    %c6_i32 = arith.constant 6 : i32
    %cst_71 = arith.constant dense<0.000000e+00> : vector<2x32xf32>
    %219 = tpu.matmul %218, %0, %cst_71 {dimension_numbers = #tpu.dot_dimension_numbers<[1], [0], [0], [1], [0, 0, 1, 1], [], []>} : vector<2x48xf32>, vector<48x32xf32>, vector<2x32xf32> -> vector<2x32xf32>
    %220 = vector.broadcast %1 : vector<1x32xf32> to vector<2x32xf32>
    %221 = arith.addf %219, %220 : vector<2x32xf32>
    %cst_72 = arith.constant 1.000000e+00 : f32
    %222 = vector.broadcast %cst_72 : f32 to vector<2x32xf32>
    %223 = arith.cmpf ogt, %194, %222 : vector<2x32xf32>
    %224 = arith.extui %223 : vector<2x32xi1> to vector<2x32xi32>
    %225 = arith.sitofp %224 : vector<2x32xi32> to vector<2x32xf32>
    %226 = arith.addf %194, %221 : vector<2x32xf32>
    %cst_73 = arith.constant 1.000000e+00 : f32
    %227 = vector.broadcast %cst_73 : f32 to vector<2x32xf32>
    %228 = arith.mulf %225, %227 : vector<2x32xf32>
    %229 = arith.subf %226, %228 : vector<2x32xf32>
    %cst_74 = arith.constant 1.000000e+00 : f32
    %230 = vector.broadcast %cst_74 : f32 to vector<2x32xf32>
    %231 = arith.cmpf ogt, %229, %230 : vector<2x32xf32>
    %232 = arith.extui %231 : vector<2x32xi1> to vector<2x32xi32>
    %233 = arith.sitofp %232 : vector<2x32xi32> to vector<2x32xf32>
    %cst_75 = arith.constant dense<0.000000e+00> : vector<2x16xf32>
    %234 = tpu.matmul %233, %2, %cst_75 {dimension_numbers = #tpu.dot_dimension_numbers<[1], [0], [0], [1], [0, 0, 1, 1], [], []>} : vector<2x32xf32>, vector<32x16xf32>, vector<2x16xf32> -> vector<2x16xf32>
    %235 = vector.broadcast %3 : vector<1x16xf32> to vector<2x16xf32>
    %236 = arith.addf %234, %235 : vector<2x16xf32>
    %cst_76 = arith.constant 1.000000e+00 : f32
    %237 = vector.broadcast %cst_76 : f32 to vector<2x16xf32>
    %238 = arith.cmpf ogt, %209, %237 : vector<2x16xf32>
    %239 = arith.extui %238 : vector<2x16xi1> to vector<2x16xi32>
    %240 = arith.sitofp %239 : vector<2x16xi32> to vector<2x16xf32>
    %241 = arith.addf %209, %236 : vector<2x16xf32>
    %cst_77 = arith.constant 1.000000e+00 : f32
    %242 = vector.broadcast %cst_77 : f32 to vector<2x16xf32>
    %243 = arith.mulf %240, %242 : vector<2x16xf32>
    %244 = arith.subf %241, %243 : vector<2x16xf32>
    %cst_78 = arith.constant 1.000000e+00 : f32
    %245 = vector.broadcast %cst_78 : f32 to vector<2x16xf32>
    %246 = arith.cmpf ogt, %244, %245 : vector<2x16xf32>
    %247 = arith.extui %246 : vector<2x16xi1> to vector<2x16xi32>
    %248 = arith.sitofp %247 : vector<2x16xi32> to vector<2x16xf32>
    %249 = arith.index_cast %c6_i32 : i32 to index
    %c0_79 = arith.constant 0 : index
    %c0_80 = arith.constant 0 : index
    %250 = vector.load %arg6[%249, %c0_79, %c0_80] : memref<8x2x16xf32, #tpu.memory_space<vmem>>, vector<1x2x16xf32>
    %251 = vector.shape_cast %250 : vector<1x2x16xf32> to vector<2x16xf32>
    %252 = vector.shape_cast %248 : vector<2x16xf32> to vector<1x2x16xf32>
    tpu.vector_store %arg6[%249, %c0_79, %c0_80], %252 {strides = array<i32>} : memref<8x2x16xf32, #tpu.memory_space<vmem>>, vector<1x2x16xf32>,
    %253 = tpu.concatenate %248, %233 in 1 : vector<2x16xf32>, vector<2x32xf32> -> vector<2x48xf32>
    %c7_i32 = arith.constant 7 : i32
    %cst_81 = arith.constant dense<0.000000e+00> : vector<2x32xf32>
    %254 = tpu.matmul %253, %0, %cst_81 {dimension_numbers = #tpu.dot_dimension_numbers<[1], [0], [0], [1], [0, 0, 1, 1], [], []>} : vector<2x48xf32>, vector<48x32xf32>, vector<2x32xf32> -> vector<2x32xf32>
    %255 = vector.broadcast %1 : vector<1x32xf32> to vector<2x32xf32>
    %256 = arith.addf %254, %255 : vector<2x32xf32>
    %cst_82 = arith.constant 1.000000e+00 : f32
    %257 = vector.broadcast %cst_82 : f32 to vector<2x32xf32>
    %258 = arith.cmpf ogt, %229, %257 : vector<2x32xf32>
    %259 = arith.extui %258 : vector<2x32xi1> to vector<2x32xi32>
    %260 = arith.sitofp %259 : vector<2x32xi32> to vector<2x32xf32>
    %261 = arith.addf %229, %256 : vector<2x32xf32>
    %cst_83 = arith.constant 1.000000e+00 : f32
    %262 = vector.broadcast %cst_83 : f32 to vector<2x32xf32>
    %263 = arith.mulf %260, %262 : vector<2x32xf32>
    %264 = arith.subf %261, %263 : vector<2x32xf32>
    %cst_84 = arith.constant 1.000000e+00 : f32
    %265 = vector.broadcast %cst_84 : f32 to vector<2x32xf32>
    %266 = arith.cmpf ogt, %264, %265 : vector<2x32xf32>
    %267 = arith.extui %266 : vector<2x32xi1> to vector<2x32xi32>
    %268 = arith.sitofp %267 : vector<2x32xi32> to vector<2x32xf32>
    %cst_85 = arith.constant dense<0.000000e+00> : vector<2x16xf32>
    %269 = tpu.matmul %268, %2, %cst_85 {dimension_numbers = #tpu.dot_dimension_numbers<[1], [0], [0], [1], [0, 0, 1, 1], [], []>} : vector<2x32xf32>, vector<32x16xf32>, vector<2x16xf32> -> vector<2x16xf32>
    %270 = vector.broadcast %3 : vector<1x16xf32> to vector<2x16xf32>
    %271 = arith.addf %269, %270 : vector<2x16xf32>
    %cst_86 = arith.constant 1.000000e+00 : f32
    %272 = vector.broadcast %cst_86 : f32 to vector<2x16xf32>
    %273 = arith.cmpf ogt, %244, %272 : vector<2x16xf32>
    %274 = arith.extui %273 : vector<2x16xi1> to vector<2x16xi32>
    %275 = arith.sitofp %274 : vector<2x16xi32> to vector<2x16xf32>
    %276 = arith.addf %244, %271 : vector<2x16xf32>
    %cst_87 = arith.constant 1.000000e+00 : f32
    %277 = vector.broadcast %cst_87 : f32 to vector<2x16xf32>
    %278 = arith.mulf %275, %277 : vector<2x16xf32>
    %279 = arith.subf %276, %278 : vector<2x16xf32>
    %cst_88 = arith.constant 1.000000e+00 : f32
    %280 = vector.broadcast %cst_88 : f32 to vector<2x16xf32>
    %281 = arith.cmpf ogt, %279, %280 : vector<2x16xf32>
    %282 = arith.extui %281 : vector<2x16xi1> to vector<2x16xi32>
    %283 = arith.sitofp %282 : vector<2x16xi32> to vector<2x16xf32>
    %284 = arith.index_cast %c7_i32 : i32 to index
    %c0_89 = arith.constant 0 : index
    %c0_90 = arith.constant 0 : index
    %285 = vector.load %arg6[%284, %c0_89, %c0_90] : memref<8x2x16xf32, #tpu.memory_space<vmem>>, vector<1x2x16xf32>
    %286 = vector.shape_cast %285 : vector<1x2x16xf32> to vector<2x16xf32>
    %287 = vector.shape_cast %283 : vector<2x16xf32> to vector<1x2x16xf32>
    tpu.vector_store %arg6[%284, %c0_89, %c0_90], %287 {strides = array<i32>} : memref<8x2x16xf32, #tpu.memory_space<vmem>>, vector<1x2x16xf32>,
    %288 = tpu.concatenate %283, %268 in 1 : vector<2x16xf32>, vector<2x32xf32> -> vector<2x48xf32>
    %c8_i32 = arith.constant 8 : i32
    return
  }
  func.func @transform_0(%arg0: i32) -> (i32, i32) {
    %c0_i32 = arith.constant 0 : i32
    %c0_i32_0 = arith.constant 0 : i32
    %c0_i32_1 = arith.constant 0 : i32
    return %c0_i32, %c0_i32_0 : i32, i32
  }
  func.func @transform_1(%arg0: i32) -> (i32, i32) {
    %c0_i32 = arith.constant 0 : i32
    %c0_i32_0 = arith.constant 0 : i32
    %c0_i32_1 = arith.constant 0 : i32
    return %c0_i32, %c0_i32_0 : i32, i32
  }
  func.func @transform_2(%arg0: i32) -> (i32, i32) {
    %c0_i32 = arith.constant 0 : i32
    %c0_i32_0 = arith.constant 0 : i32
    %c0_i32_1 = arith.constant 0 : i32
    return %c0_i32, %c0_i32_0 : i32, i32
  }
  func.func @transform_3(%arg0: i32) -> (i32, i32) {
    %c0_i32 = arith.constant 0 : i32
    %c0_i32_0 = arith.constant 0 : i32
    %c0_i32_1 = arith.constant 0 : i32
    return %c0_i32, %c0_i32_0 : i32, i32
  }
  func.func @transform_4(%arg0: i32) -> (i32, i32) {
    %c0_i32 = arith.constant 0 : i32
    %c0_i32_0 = arith.constant 0 : i32
    %c0_i32_1 = arith.constant 0 : i32
    return %c0_i32, %c0_i32_0 : i32, i32
  }
  func.func @transform_5(%arg0: i32) -> (i32, i32, i32) {
    %c0_i32 = arith.constant 0 : i32
    %c0_i32_0 = arith.constant 0 : i32
    %c0_i32_1 = arith.constant 0 : i32
    %c0_i32_2 = arith.constant 0 : i32
    return %c0_i32, %c0_i32_0, %c0_i32_1 : i32, i32, i32
  }
}

</mosaic_0001>

<bundles_post_ra>
// kernel: tpu_custom_call.1
= control target key start
LH: loop header
LB: loop body
LE: loop exit
PB: predicated region body
PF: predicated region fallthrough
CT: control target
= control target key end

     0   :  { %v1850_v3 = vmov 0.0|0.0   ;;  %vm1851_vm0 = vmmov 0   ;;  %v1852_v6 = vmov 0.0   ;;  %s2135_s0 = inlined_call_operand.vmem [shape: f32[2,16], index: 0, kind: input, shape index: {}]   ;;  %s2136_s1 = inlined_call_operand.vmem [shape: f32[48,32], index: 1, kind: input, shape index: {}]   ;;  %s2137_s2 = inlined_call_operand.vmem [shape: f32[1,32], index: 2, kind: input, shape index: {}]   ;;  %s2138_s3 = inlined_call_operand.vmem [shape: f32[32,16], index: 3, kind: input, shape index: {}]   ;;  %s2139_s4 = inlined_call_operand.vmem [shape: f32[1,16], index: 4, kind: input, shape index: {}]   ;;  %s2140_s5 = inlined_call_operand.hbm [shape: f32[8,2,16], index: 5, kind: output, shape index: {}]  }
   0x1   :  { %v21_v0 = vld [vmem:[%s2136_s1] sm:$0xff]  ;;  %v22_v1 = vld [vmem:[%s2136_s1 + $0x8] sm:$0xff]  ;;  %v23_v2 = vld [vmem:[%s2136_s1 + $0x10] sm:$0xff]  ;;  %1699 = vmatprep.subr.bf16.mxu0 %v1850_v3  ;;  %1503 = vmatprep.mubr.msk.f32.mxu0 %vm1851_vm0, %v1852_v6 }
   0x2   :  { %v1897_v4 = vpack.c.bf16 %v22_v1, %v21_v0  ;;  %v24_v5 = vld [vmem:[%s2136_s1 + $0x18] sm:$0xff]  ;;  %1708 = vmatprep.subr.bf16.mxu1 %v1850_v3  ;;  %v28_v7 = vld [vmem:[%s2138_s3] sm:$0xff]  ;;  %v29_v8 = vld [vmem:[%s2138_s3 + $0x8] sm:$0xff]  ;;  %1514 = vmatprep.mubr.msk.f32.mxu1 %vm1851_vm0, %v1852_v6 }
   0x3   :  { %v1914_v9 = vpack.c.bf16 %v24_v5, %v23_v2  ;;  %v1916_v10 = vpack.c.bf16 %v29_v8, %v28_v7 }
   0x4   :  { %1701 = vmatpush3.bf16.msra.mxu0 %v1897_v4 }
   0x5   :  { %10 = vsyncpa [#allocation3], 0  ;;  %1702 = vmatprep.subr.bf16.mxu0 %v1850_v3  ;;  %v25_v11 = vld [vmem:[%s2136_s1 + $0x20] sm:$0xff]  ;;  %v26_v12 = vld [vmem:[%s2136_s1 + $0x28] sm:$0xff]  ;;  %1710 = vmatpush3.bf16.msra.mxu1 %v1916_v10  ;;  %vm34_vm1 = vcmask 130048   ;;  %vm42_vm2 = vcmask 392192  }
   0x6   :  { %1711 = vmatprep.subr.bf16.mxu1 %v1850_v3  ;;  %v1928_v13 = vpack.c.bf16 %v26_v12, %v25_v11  ;;  %v33_v14 = vld [vmem:[%s2135_s0] sm:$0x3]  ;;  %v30_v16 = vld [vmem:[%s2138_s3 + $0x10] sm:$0xff]  ;;  %v31_v17 = vld [vmem:[%s2138_s3 + $0x18] sm:$0xff]  ;;  %vm130_vm3 = vcmask 261120   ;;  %s1853_s3 = smov 16  }
   0x7   :  { %v35_v15 = vsel %vm34_vm1, %v33_v14, 0.0  ;;  %v1948_v18 = vpack.c.bf16 %v31_v17, %v30_v16  ;;  %v1957_v19 = vld [vmem:[%s2137_s2] ss:$0 sm:$0xff]  ;;  %vm209_vm5 = vcmask 123904  }
   0x8   :  { %1704 = vmatpush3.bf16.msra.mxu0 %v1914_v9  ;;  %v1974_v24 = vld [vmem:[%s2139_s4] ss:$0 sm:$0xff]  ;;  %s1854_s4 = smov [#allocation2]  }
   0x9   :  { %1705 = vmatprep.subr.bf16.mxu0 %v1850_v3  ;;  %1713 = vmatpush3.bf16.msra.mxu1 %v1948_v18  ;;  %s1350_s16 = sshll.u32 %s1854_s4, 4  ;;  %s1351_s16 = int_to_ptr.vmem [resolvable:$true] %s1350_s16 }
   0xa   :  { %1714 = vmatprep.subr.bf16.mxu1 %v1850_v3  ;;  %s1826_s17 = scalar_lea.vmem %s1351_s16, 256  ;;  %p1831_p1 = scmp.lt.s32.totalorder %s1351_s16, %s1351_s16 }
   0xb   :  { %p1827_p0 = scmp.ne.s32.totalorder %s1351_s16, %s1826_s17  ;;  %p1832_p2 = scmp.lt.s32.totalorder %s1826_s17, %s1826_s17 }
   0xc   :  { %1707 = vmatpush3.bf16.msra.mxu0 %v1928_v13 }
   0xd   :  { %1723 = vmatprep.subr.bf16.mxu0 %v1850_v3  ;;  %p1833_p3 = por %p1832_p2, %p1831_p1 }
   0xf   :  { %1504 = vmatmul.mubr.msk.f32.vlgmr.msra.gmra.mrb[0].mxu0 %vm42_vm2, %v35_v15  ;;  %p1834_p4 = pnand %p1833_p3, %p1827_p0 }
  0x10   :  { %1725 = vmatpush3.bf16.msra.mxu0 %v1916_v10  ;;  %1540 = vmatprep.mubr.msk.f32.mxu0 %vm1851_vm0, %v1852_v6 }
  0x11   :  { %1726 = vmatprep.subr.bf16.mxu0 %v1850_v3 }
  0x14   :  { %1728 = vmatpush3.bf16.msra.mxu0 %v1948_v18 }
  0x15   :  { %1729 = vmatprep.subr.bf16.mxu0 %v1850_v3 }
  0xe2   :  { %v112_v20 = vpop.f32.mrb[0].mxu0 }
  0xe3   :  { %v113_v21 = vadd.f32 %v1957_v19, %v112_v20  ;;  %v1505_v22 = vpop.f32.mrb[1].mxu0 }
  0xe5   :  { %vm121_vm4 = vcmp.gt.f32.partialorder %v113_v21, 1.0 }
  0xe6   :  { %v1363_v23 = vsel %vm121_vm4, 1.0, %v1852_v6 }
  0xe7   :  { %211 = vrot.lane.b32.xlu0 %v1363_v23, %s1853_s3  ;;  %1515 = vmatmul.mubr.msk.f32.vlgmr.msra.gmra.mrb[0].mxu1 %vm130_vm3, %v1363_v23 }
  0xe8   :  { %1716 = vmatpush3.bf16.msra.mxu1 %v1897_v4  ;;  %1529 = vmatprep.mubr.msk.f32.mxu1 %vm1851_vm0, %v1852_v6 }
  0xe9   :  { %1717 = vmatprep.subr.bf16.mxu1 %v1850_v3 }
  0xec   :  { %1719 = vmatpush3.bf16.msra.mxu1 %v1914_v9 }
  0xed   :  { %1720 = vmatprep.subr.bf16.mxu1 %v1850_v3 }
  0xf0   :  { %1722 = vmatpush3.bf16.msra.mxu1 %v1928_v13 }
  0xf1   :  { %1738 = vmatprep.subr.bf16.mxu1 %v1850_v3 }
 0x159   :  { %v212_v28 = vpop.permute.xlu0 %211 }
 0x1ba   :  { %v200_v25 = vpop.f32.mrb[0].mxu1 }
 0x1bb   :  { %v201_v26 = vadd.f32 %v1974_v24, %v200_v25  ;;  %v1516_v27 = vpop.f32.mrb[1].mxu1 }
 0x1bd   :  { %vm206_vm6 = vcmp.gt.f32.partialorder %v201_v26, 1.0 }
 0x1be   :  { %v1366_v29 = vsel %vm206_vm6, 1.0, %v1852_v6 }
 0x1bf   :  { %210 = vst.msk [vmem:[#allocation2] sm:$0x3] %vm209_vm5, %v1366_v29  ;;  %v214_v30 = vsel %vm34_vm1, %v1366_v29, %v212_v28 }
 0x1c0   :  { %1530 = vmatmul.mubr.msk.f32.vlgmr.msra.gmra.mrb[2].mxu1 %vm42_vm2, %v214_v30 }
 0x1c1   :  { %1740 = vmatpush3.bf16.msra.mxu1 %v1916_v10  ;;  %1566 = vmatprep.mubr.msk.f32.mxu1 %vm1851_vm0, %v1852_v6 }
 0x1c2   :  { %1741 = vmatprep.subr.bf16.mxu1 %v1850_v3 }
 0x1c5   :  { %1743 = vmatpush3.bf16.msra.mxu1 %v1948_v18 }
 0x1c6   :  { %1744 = vmatprep.subr.bf16.mxu1 %v1850_v3 }
 0x293   :  { %v284_v31 = vpop.f32.mrb[2].mxu1 }
 0x294   :  { %v285_v32 = vadd.f32 %v1957_v19, %v284_v31  ;;  %v1531_v33 = vpop.f32.mrb[3].mxu1 }
 0x296   :  { %v288_v34 = vadd.f32 %v285_v32, %v113_v21 }
 0x298   :  { %v289_v35 = vsub.f32 %v288_v34, %v1363_v23 }
 0x29a   :  { %vm290_vm7 = vcmp.gt.f32.partialorder %v289_v35, 1.0 }
 0x29b   :  { %v1368_v36 = vsel %vm290_vm7, 1.0, %v1852_v6 }
 0x29c   :  { %373 = vrot.lane.b32.xlu0 %v1368_v36, %s1853_s3  ;;  %1541 = vmatmul.mubr.msk.f32.vlgmr.msra.gmra.mrb[2].mxu0 %vm130_vm3, %v1368_v36 }
 0x29d   :  { %1731 = vmatpush3.bf16.msra.mxu0 %v1897_v4  ;;  %1555 = vmatprep.mubr.msk.f32.mxu0 %vm1851_vm0, %v1852_v6 }
 0x29e   :  { %1732 = vmatprep.subr.bf16.mxu0 %v1850_v3 }
 0x2a1   :  { %1734 = vmatpush3.bf16.msra.mxu0 %v1914_v9 }
 0x2a2   :  { %1735 = vmatprep.subr.bf16.mxu0 %v1850_v3 }
 0x2a5   :  { %1737 = vmatpush3.bf16.msra.mxu0 %v1928_v13 }
 0x2a6   :  { %1753 = vmatprep.subr.bf16.mxu0 %v1850_v3 }
 0x30e   :  { %v374_v42 = vpop.permute.xlu0 %373 }
 0x36f   :  { %v362_v37 = vpop.f32.mrb[2].mxu0 }
 0x370   :  { %v363_v38 = vadd.f32 %v1974_v24, %v362_v37  ;;  %v1542_v39 = vpop.f32.mrb[3].mxu0 }
 0x372   :  { %v366_v40 = vadd.f32 %v363_v38, %v201_v26 }
 0x374   :  { %v367_v41 = vsub.f32 %v366_v40, %v1366_v29 }
 0x376   :  { %vm368_vm8 = vcmp.gt.f32.partialorder %v367_v41, 1.0 }
 0x377   :  { %v1370_v43 = vsel %vm368_vm8, 1.0, %v1852_v6 }
 0x378   :  { %372 = vst.msk [vmem:[#allocation2 + $0x2] sm:$0x3] %vm209_vm5, %v1370_v43  ;;  %v376_v44 = vsel %vm34_vm1, %v1370_v43, %v374_v42 }
 0x379   :  { %1556 = vmatmul.mubr.msk.f32.vlgmr.msra.gmra.mrb[4].mxu0 %vm42_vm2, %v376_v44 }
 0x37a   :  { %1755 = vmatpush3.bf16.msra.mxu0 %v1916_v10  ;;  %1592 = vmatprep.mubr.msk.f32.mxu0 %vm1851_vm0, %v1852_v6 }
 0x37b   :  { %1756 = vmatprep.subr.bf16.mxu0 %v1850_v3 }
 0x37e   :  { %1758 = vmatpush3.bf16.msra.mxu0 %v1948_v18 }
 0x37f   :  { %1759 = vmatprep.subr.bf16.mxu0 %v1850_v3 }
 0x44c   :  { %v446_v45 = vpop.f32.mrb[4].mxu0 }
 0x44d   :  { %v447_v46 = vadd.f32 %v1957_v19, %v446_v45  ;;  %v1557_v47 = vpop.f32.mrb[5].mxu0 }
 0x44f   :  { %v450_v48 = vadd.f32 %v447_v46, %v289_v35 }
 0x451   :  { %v451_v49 = vsub.f32 %v450_v48, %v1368_v36 }
 0x453   :  { %vm452_vm9 = vcmp.gt.f32.partialorder %v451_v49, 1.0 }
 0x454   :  { %v1372_v50 = vsel %vm452_vm9, 1.0, %v1852_v6 }
 0x455   :  { %535 = vrot.lane.b32.xlu1 %v1372_v50, %s1853_s3  ;;  %1567 = vmatmul.mubr.msk.f32.vlgmr.msra.gmra.mrb[4].mxu1 %vm130_vm3, %v1372_v50 }
 0x456   :  { %1746 = vmatpush3.bf16.msra.mxu1 %v1897_v4  ;;  %1581 = vmatprep.mubr.msk.f32.mxu1 %vm1851_vm0, %v1852_v6 }
 0x457   :  { %1747 = vmatprep.subr.bf16.mxu1 %v1850_v3 }
 0x45a   :  { %1749 = vmatpush3.bf16.msra.mxu1 %v1914_v9 }
 0x45b   :  { %1750 = vmatprep.subr.bf16.mxu1 %v1850_v3 }
 0x45e   :  { %1752 = vmatpush3.bf16.msra.mxu1 %v1928_v13 }
 0x45f   :  { %1768 = vmatprep.subr.bf16.mxu1 %v1850_v3 }
 0x4c7   :  { %v536_v56 = vpop.permute.xlu1 %535 }
 0x528   :  { %v524_v51 = vpop.f32.mrb[4].mxu1 }
 0x529   :  { %v525_v52 = vadd.f32 %v1974_v24, %v524_v51  ;;  %v1568_v53 = vpop.f32.mrb[5].mxu1 }
 0x52b   :  { %v528_v54 = vadd.f32 %v525_v52, %v367_v41 }
 0x52d   :  { %v529_v55 = vsub.f32 %v528_v54, %v1370_v43 }
 0x52f   :  { %vm530_vm10 = vcmp.gt.f32.partialorder %v529_v55, 1.0 }
 0x530   :  { %v1374_v57 = vsel %vm530_vm10, 1.0, %v1852_v6 }
 0x531   :  { %534 = vst.msk [vmem:[#allocation2 + $0x4] sm:$0x3] %vm209_vm5, %v1374_v57  ;;  %v538_v58 = vsel %vm34_vm1, %v1374_v57, %v536_v56 }
 0x532   :  { %1582 = vmatmul.mubr.msk.f32.vlgmr.msra.gmra.mrb[6].mxu1 %vm42_vm2, %v538_v58 }
 0x533   :  { %1770 = vmatpush3.bf16.msra.mxu1 %v1916_v10  ;;  %1618 = vmatprep.mubr.msk.f32.mxu1 %vm1851_vm0, %v1852_v6 }
 0x534   :  { %1771 = vmatprep.subr.bf16.mxu1 %v1850_v3 }
 0x537   :  { %1773 = vmatpush3.bf16.msra.mxu1 %v1948_v18 }
 0x538   :  { %1774 = vmatprep.subr.bf16.mxu1 %v1850_v3 }
 0x605   :  { %v608_v59 = vpop.f32.mrb[6].mxu1 }
 0x606   :  { %v609_v60 = vadd.f32 %v1957_v19, %v608_v59  ;;  %v1583_v61 = vpop.f32.mrb[7].mxu1 }
 0x608   :  { %v612_v62 = vadd.f32 %v609_v60, %v451_v49 }
 0x60a   :  { %v613_v63 = vsub.f32 %v612_v62, %v1372_v50 }
 0x60c   :  { %vm614_vm11 = vcmp.gt.f32.partialorder %v613_v63, 1.0 }
 0x60d   :  { %v1376_v0 = vsel %vm614_vm11, 1.0, %v1852_v6 }
 0x60e   :  { %697 = vrot.lane.b32.xlu1 %v1376_v0, %s1853_s3  ;;  %1593 = vmatmul.mubr.msk.f32.vlgmr.msra.gmra.mrb[6].mxu0 %vm130_vm3, %v1376_v0 }
 0x60f   :  { %1761 = vmatpush3.bf16.msra.mxu0 %v1897_v4  ;;  %1607 = vmatprep.mubr.msk.f32.mxu0 %vm1851_vm0, %v1852_v6 }
 0x610   :  { %1762 = vmatprep.subr.bf16.mxu0 %v1850_v3 }
 0x613   :  { %1764 = vmatpush3.bf16.msra.mxu0 %v1914_v9 }
 0x614   :  { %1765 = vmatprep.subr.bf16.mxu0 %v1850_v3 }
 0x617   :  { %1767 = vmatpush3.bf16.msra.mxu0 %v1928_v13 }
 0x618   :  { %1783 = vmatprep.subr.bf16.mxu0 %v1850_v3 }
 0x680   :  { %v698_v11 = vpop.permute.xlu1 %697 }
 0x6e1   :  { %v686_v1 = vpop.f32.mrb[6].mxu0 }
 0x6e2   :  { %v687_v2 = vadd.f32 %v1974_v24, %v686_v1  ;;  %v1594_v5 = vpop.f32.mrb[7].mxu0 }
 0x6e4   :  { %v690_v7 = vadd.f32 %v687_v2, %v529_v55 }
 0x6e6   :  { %v691_v8 = vsub.f32 %v690_v7, %v1374_v57 }
 0x6e8   :  { %vm692_vm12 = vcmp.gt.f32.partialorder %v691_v8, 1.0 }
 0x6e9   :  { %v1378_v12 = vsel %vm692_vm12, 1.0, %v1852_v6 }
 0x6ea   :  { %696 = vst.msk [vmem:[#allocation2 + $0x6] sm:$0x3] %vm209_vm5, %v1378_v12  ;;  %v700_v14 = vsel %vm34_vm1, %v1378_v12, %v698_v11 }
 0x6eb   :  { %1608 = vmatmul.mubr.msk.f32.vlgmr.msra.gmra.mrb[8].mxu0 %vm42_vm2, %v700_v14 }
 0x6ec   :  { %1785 = vmatpush3.bf16.msra.mxu0 %v1916_v10  ;;  %1644 = vmatprep.mubr.msk.f32.mxu0 %vm1851_vm0, %v1852_v6 }
 0x6ed   :  { %1786 = vmatprep.subr.bf16.mxu0 %v1850_v3 }
 0x6f0   :  { %1788 = vmatpush3.bf16.msra.mxu0 %v1948_v18 }
 0x6f1   :  { %1789 = vmatprep.subr.bf16.mxu0 %v1850_v3 }
 0x7be   :  { %v770_v15 = vpop.f32.mrb[8].mxu0 }
 0x7bf   :  { %v771_v16 = vadd.f32 %v1957_v19, %v770_v15  ;;  %v1609_v17 = vpop.f32.mrb[9].mxu0 }
 0x7c1   :  { %v774_v20 = vadd.f32 %v771_v16, %v613_v63 }
 0x7c3   :  { %v775_v21 = vsub.f32 %v774_v20, %v1376_v0 }
 0x7c5   :  { %vm776_vm13 = vcmp.gt.f32.partialorder %v775_v21, 1.0 }
 0x7c6   :  { %v1380_v22 = vsel %vm776_vm13, 1.0, %v1852_v6 }
 0x7c7   :  { %859 = vrot.lane.b32.xlu0 %v1380_v22, %s1853_s3  ;;  %1619 = vmatmul.mubr.msk.f32.vlgmr.msra.gmra.mrb[8].mxu1 %vm130_vm3, %v1380_v22 }
 0x7c8   :  { %1776 = vmatpush3.bf16.msra.mxu1 %v1897_v4  ;;  %1633 = vmatprep.mubr.msk.f32.mxu1 %vm1851_vm0, %v1852_v6 }
 0x7c9   :  { %1777 = vmatprep.subr.bf16.mxu1 %v1850_v3 }
 0x7cc   :  { %1779 = vmatpush3.bf16.msra.mxu1 %v1914_v9 }
 0x7cd   :  { %1780 = vmatprep.subr.bf16.mxu1 %v1850_v3 }
 0x7d0   :  { %1782 = vmatpush3.bf16.msra.mxu1 %v1928_v13 }
 0x7d1   :  { %1798 = vmatprep.subr.bf16.mxu1 %v1850_v3 }
 0x839   :  { %v860_v29 = vpop.permute.xlu0 %859 }
 0x89a   :  { %v848_v23 = vpop.f32.mrb[8].mxu1 }
 0x89b   :  { %v849_v25 = vadd.f32 %v1974_v24, %v848_v23  ;;  %v1620_v26 = vpop.f32.mrb[9].mxu1 }
 0x89d   :  { %v852_v27 = vadd.f32 %v849_v25, %v691_v8 }
 0x89f   :  { %v853_v28 = vsub.f32 %v852_v27, %v1378_v12 }
 0x8a1   :  { %vm854_vm14 = vcmp.gt.f32.partialorder %v853_v28, 1.0 }
 0x8a2   :  { %v1382_v30 = vsel %vm854_vm14, 1.0, %v1852_v6 }
 0x8a3   :  { %858 = vst.msk [vmem:[#allocation2 + $0x8] sm:$0x3] %vm209_vm5, %v1382_v30  ;;  %v862_v31 = vsel %vm34_vm1, %v1382_v30, %v860_v29 }
 0x8a4   :  { %1634 = vmatmul.mubr.msk.f32.vlgmr.msra.gmra.mrb[10].mxu1 %vm42_vm2, %v862_v31 }
 0x8a5   :  { %1800 = vmatpush3.bf16.msra.mxu1 %v1916_v10  ;;  %1670 = vmatprep.mubr.msk.f32.mxu1 %vm1851_vm0, %v1852_v6 }
 0x8a6   :  { %1801 = vmatprep.subr.bf16.mxu1 %v1850_v3 }
 0x8a9   :  { %1803 = vmatpush3.bf16.msra.mxu1 %v1948_v18 }
 0x8aa   :  { %1804 = vmatprep.subr.bf16.mxu1 %v1850_v3 }
 0x977   :  { %v932_v32 = vpop.f32.mrb[10].mxu1 }
 0x978   :  { %v933_v33 = vadd.f32 %v1957_v19, %v932_v32  ;;  %v1635_v34 = vpop.f32.mrb[11].mxu1 }
 0x97a   :  { %v936_v35 = vadd.f32 %v933_v33, %v775_v21 }
 0x97c   :  { %v937_v36 = vsub.f32 %v936_v35, %v1380_v22 }
 0x97e   :  { %vm938_vm15 = vcmp.gt.f32.partialorder %v937_v36, 1.0 }
 0x97f   :  { %v1384_v37 = vsel %vm938_vm15, 1.0, %v1852_v6 }
 0x980   :  { %1021 = vrot.lane.b32.xlu1 %v1384_v37, %s1853_s3  ;;  %1645 = vmatmul.mubr.msk.f32.vlgmr.msra.gmra.mrb[10].mxu0 %vm130_vm3, %v1384_v37 }
 0x981   :  { %1791 = vmatpush3.bf16.msra.mxu0 %v1897_v4  ;;  %1659 = vmatprep.mubr.msk.f32.mxu0 %vm1851_vm0, %v1852_v6 }
 0x982   :  { %1792 = vmatprep.subr.bf16.mxu0 %v1850_v3 }
 0x985   :  { %1794 = vmatpush3.bf16.msra.mxu0 %v1914_v9 }
 0x986   :  { %1795 = vmatprep.subr.bf16.mxu0 %v1850_v3 }
 0x989   :  { %1797 = vmatpush3.bf16.msra.mxu0 %v1928_v13 }
 0x98a   :  { %1813 = vmatprep.subr.bf16.mxu0 %v1850_v3 }
 0x9f2   :  { %v1022_v43 = vpop.permute.xlu1 %1021 }
 0xa53   :  { %v1010_v38 = vpop.f32.mrb[10].mxu0 }
 0xa54   :  { %v1011_v39 = vadd.f32 %v1974_v24, %v1010_v38  ;;  %v1646_v40 = vpop.f32.mrb[11].mxu0 }
 0xa56   :  { %v1014_v41 = vadd.f32 %v1011_v39, %v853_v28 }
 0xa58   :  { %v1015_v42 = vsub.f32 %v1014_v41, %v1382_v30 }
 0xa5a   :  { %vm1016_vm4 = vcmp.gt.f32.partialorder %v1015_v42, 1.0 }
 0xa5b   :  { %v1386_v44 = vsel %vm1016_vm4, 1.0, %v1852_v6 }
 0xa5c   :  { %1020 = vst.msk [vmem:[#allocation2 + $0xa] sm:$0x3] %vm209_vm5, %v1386_v44  ;;  %v1024_v45 = vsel %vm34_vm1, %v1386_v44, %v1022_v43 }
 0xa5d   :  { %1660 = vmatmul.mubr.msk.f32.vlgmr.msra.gmra.mrb[12].mxu0 %vm42_vm2, %v1024_v45 }
 0xa5e   :  { %1815 = vmatpush3.bf16.msra.mxu0 %v1916_v10  ;;  %1696 = vmatprep.mubr.msk.f32.mxu0 %vm1851_vm0, %v1852_v6 }
 0xa5f   :  { %1816 = vmatprep.subr.bf16.mxu0 %v1850_v3 }
 0xa62   :  { %1818 = vmatpush3.bf16.msra.mxu0 %v1948_v18 }
 0xb30   :  { %v1094_v46 = vpop.f32.mrb[12].mxu0 }
 0xb31   :  { %v1095_v47 = vadd.f32 %v1957_v19, %v1094_v46  ;;  %v1661_v48 = vpop.f32.mrb[13].mxu0 }
 0xb33   :  { %v1098_v49 = vadd.f32 %v1095_v47, %v937_v36 }
 0xb35   :  { %v1099_v50 = vsub.f32 %v1098_v49, %v1384_v37 }
 0xb37   :  { %vm1100_vm6 = vcmp.gt.f32.partialorder %v1099_v50, 1.0 }
 0xb38   :  { %v1388_v51 = vsel %vm1100_vm6, 1.0, %v1852_v6 }
 0xb39   :  { %1183 = vrot.lane.b32.xlu0 %v1388_v51, %s1853_s3  ;;  %1671 = vmatmul.mubr.msk.f32.vlgmr.msra.gmra.mrb[12].mxu1 %vm130_vm3, %v1388_v51 }
 0xb3a   :  { %1806 = vmatpush3.bf16.msra.mxu1 %v1897_v4  ;;  %1685 = vmatprep.mubr.msk.f32.mxu1 %vm1851_vm0, %v1852_v6 }
 0xb3b   :  { %1807 = vmatprep.subr.bf16.mxu1 %v1850_v3 }
 0xb3e   :  { %1809 = vmatpush3.bf16.msra.mxu1 %v1914_v9 }
 0xb3f   :  { %1810 = vmatprep.subr.bf16.mxu1 %v1850_v3 }
 0xb42   :  { %1812 = vmatpush3.bf16.msra.mxu1 %v1928_v13 }
 0xbab   :  { %v1184_v55 = vpop.permute.xlu0 %1183 }
 0xc0c   :  { %v1172_v10 = vpop.f32.mrb[12].mxu1 }
 0xc0d   :  { %v1173_v18 = vadd.f32 %v1974_v24, %v1172_v10  ;;  %v1672_v52 = vpop.f32.mrb[13].mxu1 }
 0xc0f   :  { %v1176_v53 = vadd.f32 %v1173_v18, %v1015_v42 }
 0xc11   :  { %v1177_v54 = vsub.f32 %v1176_v53, %v1386_v44 }
 0xc13   :  { %vm1178_vm7 = vcmp.gt.f32.partialorder %v1177_v54, 1.0 }
 0xc14   :  { %v1390_v4 = vsel %vm1178_vm7, 1.0, %v1852_v6 }
 0xc15   :  { %1182 = vst.msk [vmem:[#allocation2 + $0xc] sm:$0x3] %vm209_vm5, %v1390_v4  ;;  %v1186_v56 = vsel %vm34_vm1, %v1390_v4, %v1184_v55 }
 0xc16   :  { %1686 = vmatmul.mubr.msk.f32.vlgmr.msra.gmra.mrb[14].mxu1 %vm42_vm2, %v1186_v56 }
 0xce9   :  { %v1256_v9 = vpop.f32.mrb[14].mxu1 }
 0xcea   :  { %v1257_v3 = vadd.f32 %v1957_v19, %v1256_v9  ;;  %v1687_v13 = vpop.f32.mrb[15].mxu1 }
 0xcec   :  { %v1260_v57 = vadd.f32 %v1257_v3, %v1099_v50 }
 0xcee   :  { %v1261_v58 = vsub.f32 %v1260_v57, %v1388_v51 }
 0xcf0   :  { %vm1262_vm0 = vcmp.gt.f32.partialorder %v1261_v58, 1.0 }
 0xcf1   :  { %v1392_v59 = vsel %vm1262_vm0, 1.0, %v1852_v6 }
 0xcf2   :  { %1697 = vmatmul.mubr.msk.f32.vlgmr.msra.gmra.mrb[14].mxu0 %vm130_vm3, %v1392_v59 }
 0xdc5   :  { %v1334_v60 = vpop.f32.mrb[14].mxu0 }
 0xdc6   :  { %v1335_v61 = vadd.f32 %v1974_v24, %v1334_v60  ;;  %v1698_v62 = vpop.f32.mrb[15].mxu0 }
 0xdc8   :  { %v1338_v63 = vadd.f32 %v1335_v61, %v1177_v54 }
 0xdca   :  { %v1339_v0 = vsub.f32 %v1338_v63, %v1390_v4 }
 0xdcc   :  { %vm1340_vm1 = vcmp.gt.f32.partialorder %v1339_v0, 1.0 }
 0xdcd   :  { %v1394_v19 = vsel %vm1340_vm1, 1.0, %v1852_v6 }
 0xdce   :  { %1344 = vst.msk [vmem:[#allocation2 + $0xe] sm:$0x3] %vm209_vm5, %v1394_v19 }
 0xdcf   :  { %1837 = shalt.err (!%p1834_p4)
}
 0xdd0   :  { %s1838_s20 = scalar_lea.hbm %s2140_s5, 256 }
 0xdd1   :  { %p1839_p5 = scmp.ne.s32.totalorder %s2140_s5, %s1838_s20  ;;  %p1842_p6 = scmp.lt.u32.totalorder %s1838_s20, %s2140_s5 }
 0xdd3   :  { %p1844_p7 = pnand %p1842_p6, %p1839_p5 }
 0xdd5   :  { %1847 = shalt.err (!%p1844_p7)
}
 0xdd6   :  { %s1855_s25 = smov 32   ;;  %s1856_s26 = smov 2  }
 0xdd7   :  { %1356 = dma.vmem_to_hbm [thread:$0]  %s1351_s16, 256, %s2140_s5, [#allocation3], %s1855_s25, %s1855_s25, %s1856_s26  }
 0xdd8   :  { %1848 = dma.done.wait [#allocation3], 256  }
 0xdd9   :  { %1849 = vsyncadd [#allocation3], 4294967040 }
 0xdda   :  { %1360 = vsyncpa [#allocation3], 1 }

</bundles_post_ra>
